<compile_context>
chip_gen: v5e
topology: v5e:2x2
jax: 0.10.0
libtpu: 0.0.40
codegen_flags: <defaults>
</compile_context>

<pallas_src>
import functools

import jax
import jax.numpy as jnp
from jax.experimental import pallas as pl
from jax.experimental.pallas import tpu as pltpu


# --------------------------------------------------------------------------
# Helpers
# --------------------------------------------------------------------------
def _round_up(n, m):
    return (n + m - 1) // m * m


def _vmem_limit_bytes():
    # Generation-aware scoped-VMEM limit: ~48 MiB on v7x (64 MiB/TC VMEM),
    # ~96 MiB on v5e/v6e (128 MiB physical VMEM).  Conservative fallback.
    try:
        cap = int(pltpu.get_tpu_info().vmem_capacity_bytes)
    except Exception:
        cap = 64 << 20
    return int(min((cap * 3) // 4, 96 << 20))


def _choose_tb(batch, chw, kp, in_itemsize, vmem_limit):
    """Largest batch tile whose true (lane-padded, double-buffered) footprint
    fits inside the scoped-VMEM limit."""
    chwp = _round_up(chw, 128)                        # lane padding of the input tile
    per_row = 2 * chwp * in_itemsize + 2 * kp * 4     # 2x input bufs + 2x f32 output bufs
    fixed = 8 * kp * 4 + (2 << 20)                    # resident weight/bias + headroom
    tb = max(8, (vmem_limit - fixed) // per_row)
    tb = min(tb, 2048)                                # keep per-step latency reasonable
    tb = max(8, (tb // 8) * 8)                        # sublane-legal
    if batch <= tb:
        if batch >= 16:
            # Keep >= 2 grid steps so the "parallel" batch axis can shard across
            # v7x's two TensorCores and the DMA pipeline has work to overlap.
            return min(tb, _round_up((batch + 1) // 2, 8))
        return batch                                  # single full-extent block (always legal)
    return tb


# --------------------------------------------------------------------------
# Fused Pallas kernel: global-sum pool -> combined (backbone@head) projection
# --------------------------------------------------------------------------
def _fused_kernel(x_ref, w_ref, b_ref, o_ref, *, n_chan, hw):
    # x_ref: [TB, C*HW]  native dtype, batch on sublanes, lanes dense
    # w_ref: [C, Kp]     combined (1/HW * bb_w @ hd_w) weight
    # b_ref: [1, Kp]     combined (bb_b @ hd_w + hd_b) bias
    # o_ref: [TB, Kp]    f32, lane-dense (Kp multiple of 128 -> unmasked stores)
    cols = []
    for c in range(n_chan):                           # C is tiny (3-4): static unroll
        seg = x_ref[:, c * hw:(c + 1) * hw]           # [TB, HW] lane slice
        cols.append(jnp.sum(seg.astype(jnp.float32), axis=-1, keepdims=True))
    pooled = jnp.concatenate(cols, axis=-1)           # [TB, C] f32 global-sum pool (XLU)
    out = jnp.dot(pooled.astype(w_ref.dtype), w_ref[...],
                  preferred_element_type=jnp.float32)
    o_ref[...] = (out + b_ref[...].astype(jnp.float32)).astype(o_ref.dtype)


def fused_pool_project(x_nchw, w_comb, b_comb):
    """pool(H,W) then @ w_comb + b_comb, fused in one pallas_call."""
    B, C, H, W = x_nchw.shape
    HW = H * W
    CHW = C * HW
    Kp = w_comb.shape[1]

    x2d = x_nchw.reshape(B, CHW)                      # contiguous reshape: no HBM copy
    vmem_limit = _vmem_limit_bytes()
    TB = _choose_tb(B, CHW, Kp, x2d.dtype.itemsize, vmem_limit)
    grid = (pl.cdiv(B, TB),)
    # If TB does not divide B, the last block reads OOB (garbage) rows and its
    # OOB output rows are masked on store; rows are independent, so this is safe.

    kernel = functools.partial(_fused_kernel, n_chan=C, hw=HW)
    return pl.pallas_call(
        kernel,
        out_shape=jax.ShapeDtypeStruct((B, Kp), jnp.float32),
        grid=grid,
        in_specs=[
            pl.BlockSpec((TB, CHW), lambda i: (i, 0)),
            pl.BlockSpec((C, Kp), lambda i: (0, 0)),   # resident (constant block index)
            pl.BlockSpec((1, Kp), lambda i: (0, 0)),
        ],
        out_specs=pl.BlockSpec((TB, Kp), lambda i: (i, 0)),
        compiler_params=pltpu.CompilerParams(
            dimension_semantics=("parallel",),         # lets v7x's 2nd TC pick up tiles
            vmem_limit_bytes=vmem_limit,
        ),
    )(x2d, w_comb, b_comb)


# --------------------------------------------------------------------------
# Multi-crop forward (faithful to the PyTorch control flow), run under jit
# --------------------------------------------------------------------------
def _multicrop_forward(x_list, w0, b_comb, *, k_out):
    # Mirror: L = [img.shape[-1] for img in x];
    #         crop_idxs = cumsum(unique_consecutive(L, return_counts=True)[1])
    last_dims = [img.shape[-1] for img in x_list]
    crop_idxs = []
    run_start = 0
    for i in range(1, len(last_dims) + 1):
        if i == len(last_dims) or last_dims[i] != last_dims[run_start]:
            crop_idxs.append(i)
            run_start = i

    outputs = []
    start_idx = 0
    for end_idx in crop_idxs:
        # Same-resolution group.  The synthetic backbone is per-sample, so the
        # torch.cat HBM copy is skipped and each crop is streamed straight into
        # the fused kernel (identical values, identical ordering).  The
        # `_out = _out[0]` tuple-unwrap of the original is unnecessary here.
        for img in x_list[start_idx:end_idx]:
            hw = img.shape[-2] * img.shape[-1]
            w_call = w0 * (1.0 / float(hw))   # fold mean-pool's 1/HW into tiny [C, Kp] weight
            outputs.append(fused_pool_project(img, w_call, b_comb))
        start_idx = end_idx

    # Only the small [N, Kp] head outputs get concatenated; strip lane padding.
    return jnp.concatenate(outputs, axis=0)[:, :k_out]


class MultiCropWrapper:
    """JAX/Pallas equivalent of the DINO MultiCropWrapper forward pass."""

    def __init__(self, backbone_params, head_params):
        bb_w, bb_b = backbone_params
        hd_w, hd_b = head_params
        self.K = hd_w.shape[1]
        self.Kp = _round_up(self.K, 128)              # lane-dense output width
        pad = self.Kp - self.K
        hd_w_p = jnp.pad(hd_w, ((0, 0), (0, pad)))
        hd_b_p = jnp.pad(hd_b.reshape(1, -1), ((0, 0), (0, pad)))
        # backbone.head = nn.Identity()  -> synthetic backbone has no inner head.
        # TODO(synk): this backbone@head weight fold is only valid while there is
        # no nonlinearity between backbone and head (true for this linear pair).
        self.w0 = (bb_w @ hd_w_p).astype(jnp.float32)                              # [C, Kp]
        self.b_comb = (bb_b.reshape(1, -1) @ hd_w_p + hd_b_p).astype(jnp.float32)  # [1, Kp]
        self._forward = jax.jit(functools.partial(_multicrop_forward, k_out=self.K))

    def forward(self, x):
        if not isinstance(x, (list, tuple)):
            x = [x]
        return self._forward(list(x), self.w0, self.b_comb)


# --------------------------------------------------------------------------
# Demo
# --------------------------------------------------------------------------
if __name__ == "__main__":
    key = jax.random.PRNGKey(0)
    k_in1, k_in2, k_in3, k_w1, k_b1, k_w2, k_b2 = jax.random.split(key, 7)

    B, C, D, K = 2, 4, 32, 16  # per-crop batch, channels, embed dim, head dim

    # Multi-crop input: two "global" 16x16 crops + one "local" 8x8 crop.
    x = [
        jax.random.normal(k_in1, (B, C, 16, 16), dtype=jnp.float32),
        jax.random.normal(k_in2, (B, C, 16, 16), dtype=jnp.float32),
        jax.random.normal(k_in3, (B, C, 8, 8), dtype=jnp.float32),
    ]

    # Deterministic synthetic parameters.
    bb_w = jax.random.normal(k_w1, (C, D), dtype=jnp.float32) * 0.1
    bb_b = jax.random.normal(k_b1, (1, D), dtype=jnp.float32) * 0.1
    hd_w = jax.random.normal(k_w2, (D, K), dtype=jnp.float32) * 0.1
    hd_b = jax.random.normal(k_b2, (1, K), dtype=jnp.float32) * 0.1

    model = MultiCropWrapper((bb_w, bb_b), (hd_w, hd_b))
    out = jax.block_until_ready(model.forward(x))

    # Reference in plain JAX (same semantics as the PyTorch forward).
    def ref_backbone(img):
        pooled = jnp.mean(img, axis=(2, 3))
        return pooled @ bb_w + bb_b

    ref_feats = jnp.concatenate(
        [ref_backbone(jnp.concatenate(x[0:2], axis=0)), ref_backbone(x[2])], axis=0
    )
    ref_out = ref_feats @ hd_w + hd_b

    assert out.shape == (3 * B, K), out.shape
    assert jnp.allclose(out, ref_out, atol=1e-4, rtol=1e-4), float(
        jnp.max(jnp.abs(out - ref_out))
    )
    print("KERNEL_OK")
</pallas_src>

<mosaic_0001>
module attributes {stable_mosaic.version = 11 : i64} {
  func.func @_fused_kernel(%arg0: i32, %arg1: memref<2x256xf32, #tpu.memory_space<vmem>>, %arg2: memref<4x128xf32, #tpu.memory_space<vmem>>, %arg3: memref<1x128xf32, #tpu.memory_space<vmem>>, %arg4: memref<2x128xf32, #tpu.memory_space<vmem>>) attributes {dimension_semantics = [#tpu.dimension_semantics<parallel>], iteration_bounds = array<i64: 1>, scalar_prefetch = 0 : i64, scratch_operands = 0 : i64, tpu.core_type = #tpu.core_type<tc>, window_params = [{transform_indices = @transform_0, window_bounds = array<i64: 2, 256>}, {pipeline_mode = #tpu.pipeline_mode<synchronous>, transform_indices = @transform_1, window_bounds = array<i64: 4, 128>}, {pipeline_mode = #tpu.pipeline_mode<synchronous>, transform_indices = @transform_2, window_bounds = array<i64: 1, 128>}, {transform_indices = @transform_3, window_bounds = array<i64: 2, 128>}]} {
    %c0 = arith.constant 0 : index
    %c0_0 = arith.constant 0 : index
    %0 = vector.load %arg1[%c0, %c0_0] : memref<2x256xf32, #tpu.memory_space<vmem>>, vector<2x64xf32>
    %cst = arith.constant dense<0.000000e+00> : vector<2xf32>
    %1 = vector.multi_reduction <add>, %0, %cst [1] : vector<2x64xf32> to vector<2xf32>
    %2 = vector.shape_cast %1 : vector<2xf32> to vector<2x1xf32>
    %c0_1 = arith.constant 0 : index
    %c64 = arith.constant 64 : index
    %3 = vector.load %arg1[%c0_1, %c64] : memref<2x256xf32, #tpu.memory_space<vmem>>, vector<2x64xf32>
    %cst_2 = arith.constant dense<0.000000e+00> : vector<2xf32>
    %4 = vector.multi_reduction <add>, %3, %cst_2 [1] : vector<2x64xf32> to vector<2xf32>
    %5 = vector.shape_cast %4 : vector<2xf32> to vector<2x1xf32>
    %c0_3 = arith.constant 0 : index
    %c128 = arith.constant 128 : index
    %6 = vector.load %arg1[%c0_3, %c128] : memref<2x256xf32, #tpu.memory_space<vmem>>, vector<2x64xf32>
    %cst_4 = arith.constant dense<0.000000e+00> : vector<2xf32>
    %7 = vector.multi_reduction <add>, %6, %cst_4 [1] : vector<2x64xf32> to vector<2xf32>
    %8 = vector.shape_cast %7 : vector<2xf32> to vector<2x1xf32>
    %c0_5 = arith.constant 0 : index
    %c192 = arith.constant 192 : index
    %9 = vector.load %arg1[%c0_5, %c192] : memref<2x256xf32, #tpu.memory_space<vmem>>, vector<2x64xf32>
    %cst_6 = arith.constant dense<0.000000e+00> : vector<2xf32>
    %10 = vector.multi_reduction <add>, %9, %cst_6 [1] : vector<2x64xf32> to vector<2xf32>
    %11 = vector.shape_cast %10 : vector<2xf32> to vector<2x1xf32>
    %12 = tpu.concatenate %2, %5, %8, %11 in 1 : vector<2x1xf32>, vector<2x1xf32>, vector<2x1xf32>, vector<2x1xf32> -> vector<2x4xf32>
    %c0_7 = arith.constant 0 : index
    %c0_8 = arith.constant 0 : index
    %13 = vector.load %arg2[%c0_7, %c0_8] : memref<4x128xf32, #tpu.memory_space<vmem>>, vector<4x128xf32>
    %cst_9 = arith.constant dense<0.000000e+00> : vector<2x128xf32>
    %14 = tpu.matmul %12, %13, %cst_9 {dimension_numbers = #tpu.dot_dimension_numbers<[1], [0], [0], [1], [0, 0, 1, 1], [], []>} : vector<2x4xf32>, vector<4x128xf32>, vector<2x128xf32> -> vector<2x128xf32>
    %c0_10 = arith.constant 0 : index
    %c0_11 = arith.constant 0 : index
    %15 = vector.load %arg3[%c0_10, %c0_11] : memref<1x128xf32, #tpu.memory_space<vmem>>, vector<1x128xf32>
    %16 = vector.broadcast %15 : vector<1x128xf32> to vector<2x128xf32>
    %17 = arith.addf %14, %16 : vector<2x128xf32>
    %c0_12 = arith.constant 0 : index
    %c0_13 = arith.constant 0 : index
    %18 = vector.load %arg4[%c0_12, %c0_13] : memref<2x128xf32, #tpu.memory_space<vmem>>, vector<2x128xf32>
    tpu.vector_store %arg4[%c0_12, %c0_13], %17 {strides = array<i32>} : memref<2x128xf32, #tpu.memory_space<vmem>>, vector<2x128xf32>,
    return
  }
  func.func @transform_0(%arg0: i32) -> (i32, i32) {
    %c0_i32 = arith.constant 0 : i32
    %c0_i32_0 = arith.constant 0 : i32
    return %arg0, %c0_i32 : i32, i32
  }
  func.func @transform_1(%arg0: i32) -> (i32, i32) {
    %c0_i32 = arith.constant 0 : i32
    %c0_i32_0 = arith.constant 0 : i32
    %c0_i32_1 = arith.constant 0 : i32
    return %c0_i32, %c0_i32_0 : i32, i32
  }
  func.func @transform_2(%arg0: i32) -> (i32, i32) {
    %c0_i32 = arith.constant 0 : i32
    %c0_i32_0 = arith.constant 0 : i32
    %c0_i32_1 = arith.constant 0 : i32
    return %c0_i32, %c0_i32_0 : i32, i32
  }
  func.func @transform_3(%arg0: i32) -> (i32, i32) {
    %c0_i32 = arith.constant 0 : i32
    %c0_i32_0 = arith.constant 0 : i32
    return %arg0, %c0_i32 : i32, i32
  }
}

module attributes {stable_mosaic.version = 11 : i64} {
  func.func @_fused_kernel(%arg0: i32, %arg1: memref<2x1024xf32, #tpu.memory_space<vmem>>, %arg2: memref<4x128xf32, #tpu.memory_space<vmem>>, %arg3: memref<1x128xf32, #tpu.memory_space<vmem>>, %arg4: memref<2x128xf32, #tpu.memory_space<vmem>>) attributes {dimension_semantics = [#tpu.dimension_semantics<parallel>], iteration_bounds = array<i64: 1>, scalar_prefetch = 0 : i64, scratch_operands = 0 : i64, tpu.core_type = #tpu.core_type<tc>, window_params = [{transform_indices = @transform_0, window_bounds = array<i64: 2, 1024>}, {pipeline_mode = #tpu.pipeline_mode<synchronous>, transform_indices = @transform_1, window_bounds = array<i64: 4, 128>}, {pipeline_mode = #tpu.pipeline_mode<synchronous>, transform_indices = @transform_2, window_bounds = array<i64: 1, 128>}, {transform_indices = @transform_3, window_bounds = array<i64: 2, 128>}]} {
    %c0 = arith.constant 0 : index
    %c0_0 = arith.constant 0 : index
    %0 = vector.load %arg1[%c0, %c0_0] : memref<2x1024xf32, #tpu.memory_space<vmem>>, vector<2x256xf32>
    %cst = arith.constant dense<0.000000e+00> : vector<2xf32>
    %1 = vector.multi_reduction <add>, %0, %cst [1] : vector<2x256xf32> to vector<2xf32>
    %2 = vector.shape_cast %1 : vector<2xf32> to vector<2x1xf32>
    %c0_1 = arith.constant 0 : index
    %c256 = arith.constant 256 : index
    %3 = vector.load %arg1[%c0_1, %c256] : memref<2x1024xf32, #tpu.memory_space<vmem>>, vector<2x256xf32>
    %cst_2 = arith.constant dense<0.000000e+00> : vector<2xf32>
    %4 = vector.multi_reduction <add>, %3, %cst_2 [1] : vector<2x256xf32> to vector<2xf32>
    %5 = vector.shape_cast %4 : vector<2xf32> to vector<2x1xf32>
    %c0_3 = arith.constant 0 : index
    %c512 = arith.constant 512 : index
    %6 = vector.load %arg1[%c0_3, %c512] : memref<2x1024xf32, #tpu.memory_space<vmem>>, vector<2x256xf32>
    %cst_4 = arith.constant dense<0.000000e+00> : vector<2xf32>
    %7 = vector.multi_reduction <add>, %6, %cst_4 [1] : vector<2x256xf32> to vector<2xf32>
    %8 = vector.shape_cast %7 : vector<2xf32> to vector<2x1xf32>
    %c0_5 = arith.constant 0 : index
    %c768 = arith.constant 768 : index
    %9 = vector.load %arg1[%c0_5, %c768] : memref<2x1024xf32, #tpu.memory_space<vmem>>, vector<2x256xf32>
    %cst_6 = arith.constant dense<0.000000e+00> : vector<2xf32>
    %10 = vector.multi_reduction <add>, %9, %cst_6 [1] : vector<2x256xf32> to vector<2xf32>
    %11 = vector.shape_cast %10 : vector<2xf32> to vector<2x1xf32>
    %12 = tpu.concatenate %2, %5, %8, %11 in 1 : vector<2x1xf32>, vector<2x1xf32>, vector<2x1xf32>, vector<2x1xf32> -> vector<2x4xf32>
    %c0_7 = arith.constant 0 : index
    %c0_8 = arith.constant 0 : index
    %13 = vector.load %arg2[%c0_7, %c0_8] : memref<4x128xf32, #tpu.memory_space<vmem>>, vector<4x128xf32>
    %cst_9 = arith.constant dense<0.000000e+00> : vector<2x128xf32>
    %14 = tpu.matmul %12, %13, %cst_9 {dimension_numbers = #tpu.dot_dimension_numbers<[1], [0], [0], [1], [0, 0, 1, 1], [], []>} : vector<2x4xf32>, vector<4x128xf32>, vector<2x128xf32> -> vector<2x128xf32>
    %c0_10 = arith.constant 0 : index
    %c0_11 = arith.constant 0 : index
    %15 = vector.load %arg3[%c0_10, %c0_11] : memref<1x128xf32, #tpu.memory_space<vmem>>, vector<1x128xf32>
    %16 = vector.broadcast %15 : vector<1x128xf32> to vector<2x128xf32>
    %17 = arith.addf %14, %16 : vector<2x128xf32>
    %c0_12 = arith.constant 0 : index
    %c0_13 = arith.constant 0 : index
    %18 = vector.load %arg4[%c0_12, %c0_13] : memref<2x128xf32, #tpu.memory_space<vmem>>, vector<2x128xf32>
    tpu.vector_store %arg4[%c0_12, %c0_13], %17 {strides = array<i32>} : memref<2x128xf32, #tpu.memory_space<vmem>>, vector<2x128xf32>,
    return
  }
  func.func @transform_0(%arg0: i32) -> (i32, i32) {
    %c0_i32 = arith.constant 0 : i32
    %c0_i32_0 = arith.constant 0 : i32
    return %arg0, %c0_i32 : i32, i32
  }
  func.func @transform_1(%arg0: i32) -> (i32, i32) {
    %c0_i32 = arith.constant 0 : i32
    %c0_i32_0 = arith.constant 0 : i32
    %c0_i32_1 = arith.constant 0 : i32
    return %c0_i32, %c0_i32_0 : i32, i32
  }
  func.func @transform_2(%arg0: i32) -> (i32, i32) {
    %c0_i32 = arith.constant 0 : i32
    %c0_i32_0 = arith.constant 0 : i32
    %c0_i32_1 = arith.constant 0 : i32
    return %c0_i32, %c0_i32_0 : i32, i32
  }
  func.func @transform_3(%arg0: i32) -> (i32, i32) {
    %c0_i32 = arith.constant 0 : i32
    %c0_i32_0 = arith.constant 0 : i32
    return %arg0, %c0_i32 : i32, i32
  }
}

</mosaic_0001>

<bundles_post_ra>
// kernel: _multicrop_forward.3
= control target key start
LH: loop header
LB: loop body
LE: loop exit
PB: predicated region body
PF: predicated region fallthrough
CT: control target
= control target key end

     0   :  { %vm21_vm0 = vcmask 1041408   ;;  %vm78_vm1 = vcmask 1043456   ;;  %vm63_vm2 = vcmask 7168   ;;  %vm65_vm3 = vcmask 15360   ;;  %s159_s0 = inlined_call_operand.vmem [shape: f32[2,1024], index: 0, kind: input, shape index: {}]   ;;  %s160_s2 = inlined_call_operand.vmem [shape: f32[1,128], index: 2, kind: input, shape index: {}]   ;;  %s161_s1 = inlined_call_operand.vmem [shape: f32[4,128], index: 1, kind: input, shape index: {}]   ;;  %s162_s3 = inlined_call_operand.vmem [shape: f32[2,128], index: 3, kind: output, shape index: {}]  }
   0x1   :  { %v14_v0 = vld [vmem:[%s159_s0] sm:$0xf]  ;;  %v27_v1 = vld [vmem:[%s159_s0 + $0x4] sm:$0xf]  ;;  %v39_v7 = vld [vmem:[%s159_s0 + $0x8] sm:$0xf] }
   0x2   :  { %16 = vst [vmem:[#allocation1] ss:$4 sm:$0xff] %v14_v0  ;;  %v51_v13 = vld [vmem:[%s159_s0 + $0xc] sm:$0xf]  ;;  %v69_v24 = vld [vmem:[%s161_s1] sm:$0xf] }
   0x3   :  { %107 = vmatpush.msk.msra.mxu0 %vm78_vm1, %v69_v24  ;;  %vm67_vm4 = vcmask 23552   ;;  %vm74_vm5 = vcmask 31744   ;;  %v109_v32 = vld [vmem:[%s160_s2] ss:$0 sm:$0xff] }
   0x9   :  { %v17_v2 = vld.sshfl [vmem:[#allocation1] sm:$0xff pattern:$0x73625140]  ;;  %v18_v3 = vld.sshfl [vmem:[#allocation1 + $0x8] sm:$0xff pattern:$0x73625140] }
   0xa   :  { %v22_v4 = vsel %vm21_vm0, %v17_v2, 0.0  ;;  %v23_v5 = vsel %vm21_vm0, %v18_v3, 0.0  ;;  %29 = vst [vmem:[#allocation1] ss:$4 sm:$0xff] %v27_v1 }
   0xb   :  { %v24_v6 = vadd.f32 %v23_v5, %v22_v4 }
   0xd   :  { %25 = vadd.xlane.f32.xlu0 %v24_v6 }
  0x11   :  { %v30_v8 = vld.sshfl [vmem:[#allocation1] sm:$0xff pattern:$0x73625140]  ;;  %v31_v9 = vld.sshfl [vmem:[#allocation1 + $0x8] sm:$0xff pattern:$0x73625140] }
  0x12   :  { %v34_v10 = vsel %vm21_vm0, %v30_v8, 0.0  ;;  %v35_v11 = vsel %vm21_vm0, %v31_v9, 0.0  ;;  %41 = vst [vmem:[#allocation1] ss:$4 sm:$0xff] %v39_v7 }
  0x13   :  { %v36_v12 = vadd.f32 %v35_v11, %v34_v10 }
  0x15   :  { %37 = vadd.xlane.f32.xlu0 %v36_v12 }
  0x19   :  { %v42_v14 = vld.sshfl [vmem:[#allocation1] sm:$0xff pattern:$0x73625140]  ;;  %v43_v15 = vld.sshfl [vmem:[#allocation1 + $0x8] sm:$0xff pattern:$0x73625140] }
  0x1a   :  { %v46_v16 = vsel %vm21_vm0, %v42_v14, 0.0  ;;  %v47_v17 = vsel %vm21_vm0, %v43_v15, 0.0  ;;  %53 = vst [vmem:[#allocation1] ss:$4 sm:$0xff] %v51_v13 }
  0x1b   :  { %v48_v18 = vadd.f32 %v47_v17, %v46_v16 }
  0x1d   :  { %49 = vadd.xlane.f32.xlu1 %v48_v18 }
  0x21   :  { %v54_v19 = vld.sshfl [vmem:[#allocation1] sm:$0xff pattern:$0x73625140]  ;;  %v55_v20 = vld.sshfl [vmem:[#allocation1 + $0x8] sm:$0xff pattern:$0x73625140] }
  0x22   :  { %v58_v21 = vsel %vm21_vm0, %v54_v19, 0.0  ;;  %v59_v22 = vsel %vm21_vm0, %v55_v20, 0.0 }
  0x23   :  { %v60_v23 = vadd.f32 %v59_v22, %v58_v21 }
  0x25   :  { %61 = vadd.xlane.f32.xlu1 %v60_v23 }
  0x80   :  { %v26_v25 = vpop.xlane.xlu0 %25 }
  0x88   :  { %v38_v27 = vpop.xlane.xlu0 %37 }
  0x89   :  { %v64_v28 = vsel %vm63_vm2, %v26_v25, %v38_v27 }
  0x90   :  { %v50_v26 = vpop.xlane.xlu1 %49 }
  0x91   :  { %v66_v29 = vsel %vm65_vm3, %v64_v28, %v50_v26 }
  0x98   :  { %v62_v30 = vpop.xlane.xlu1 %61 }
  0x99   :  { %v68_v31 = vsel %vm67_vm4, %v66_v29, %v62_v30 }
  0x9a   :  { %108 = vmatmul.msk.f32.vlgmr.msra.gmra.mxu0 %vm74_vm5, %v68_v31 }
 0x117   :  { %v99_v33 = vpop.f32.mrf.mxu0 }
 0x118   :  { %v100_v34 = vadd.f32 %v109_v32, %v99_v33 }
 0x11a   :  { %102 = vst [vmem:[%s162_s3] sm:$0x3] %v100_v34 }

// kernel: _multicrop_forward.5
= control target key start
LH: loop header
LB: loop body
LE: loop exit
PB: predicated region body
PF: predicated region fallthrough
CT: control target
= control target key end

     0   :  { %vm15_vm0 = vcmask 517120   ;;  %s89_s16 = smov 64   ;;  %vm56_vm1 = vcmask 1043456   ;;  %vm41_vm2 = vcmask 7168   ;;  %vm43_vm3 = vcmask 15360   ;;  %s129_s0 = inlined_call_operand.vmem [shape: f32[2,256], index: 0, kind: input, shape index: {}]   ;;  %s130_s2 = inlined_call_operand.vmem [shape: f32[1,128], index: 2, kind: input, shape index: {}]   ;;  %s131_s1 = inlined_call_operand.vmem [shape: f32[4,128], index: 1, kind: input, shape index: {}]   ;;  %s132_s3 = inlined_call_operand.vmem [shape: f32[2,128], index: 3, kind: output, shape index: {}]  }
   0x1   :  { %v14_v0 = vld [vmem:[%s129_s0] sm:$0x3]  ;;  %v28_v2 = vld [vmem:[%s129_s0 + $0x2] sm:$0x3]  ;;  %vm45_vm4 = vcmask 23552   ;;  %vm52_vm5 = vcmask 31744  }
   0x2   :  { %20 = vst [vmem:[#allocation1] ss:$4 sm:$0xff] %v14_v0  ;;  %v16_v1 = vsel %vm15_vm0, %v14_v0, 0.0  ;;  %v29_v5 = vsel %vm15_vm0, %v28_v2, 0.0  ;;  %v47_v10 = vld [vmem:[%s131_s1] sm:$0xf] }
   0x3   :  { %17 = vadd.xlane.f32.xlu1 %v16_v1  ;;  %30 = vadd.xlane.f32.xlu2 %v29_v5  ;;  %v88_v18 = vld [vmem:[%s130_s2] ss:$0 sm:$0xff] }
   0x4   :  { %85 = vmatpush.msk.msra.mxu0 %vm56_vm1, %v47_v10 }
   0x9   :  { %v21_v3 = vld.sshfl [vmem:[#allocation1] sm:$0xff pattern:$0x73625140] }
   0xa   :  { %22 = vrot.lane.b32.xlu0 %v21_v3, %s89_s16  ;;  %33 = vst [vmem:[#allocation1] ss:$4 sm:$0xff] %v28_v2 }
  0x11   :  { %v34_v4 = vld.sshfl [vmem:[#allocation1] sm:$0xff pattern:$0x73625140] }
  0x12   :  { %35 = vrot.lane.b32.xlu0 %v34_v4, %s89_s16 }
  0x76   :  { %v18_v11 = vpop.xlane.xlu1 %17  ;;  %v31_v12 = vpop.xlane.xlu2 %30 }
  0x7c   :  { %v23_v6 = vpop.permute.xlu0 %22 }
  0x7d   :  { %v25_v7 = vsel %vm15_vm0, %v23_v6, 0.0 }
  0x7e   :  { %26 = vadd.xlane.f32.xlu1 %v25_v7 }
  0x84   :  { %v36_v8 = vpop.permute.xlu0 %35 }
  0x85   :  { %v38_v9 = vsel %vm15_vm0, %v36_v8, 0.0 }
  0x86   :  { %39 = vadd.xlane.f32.xlu2 %v38_v9 }
  0xf1   :  { %v27_v13 = vpop.xlane.xlu1 %26 }
  0xf2   :  { %v42_v14 = vsel %vm41_vm2, %v18_v11, %v27_v13 }
  0xf3   :  { %v44_v16 = vsel %vm43_vm3, %v42_v14, %v31_v12 }
  0xf9   :  { %v40_v15 = vpop.xlane.xlu2 %39 }
  0xfa   :  { %v46_v17 = vsel %vm45_vm4, %v44_v16, %v40_v15 }
  0xfb   :  { %86 = vmatmul.msk.f32.vlgmr.msra.gmra.mxu0 %vm52_vm5, %v46_v17 }
 0x178   :  { %v77_v19 = vpop.f32.mrf.mxu0 }
 0x179   :  { %v78_v20 = vadd.f32 %v88_v18, %v77_v19 }
 0x17b   :  { %80 = vst [vmem:[%s132_s3] sm:$0x3] %v78_v20 }

</bundles_post_ra>
